<compile_context>
chip_gen: v5e
topology: v5e:2x2
jax: 0.10.0
libtpu: 0.0.40
codegen_flags: <defaults>
</compile_context>

<pallas_src>
import math

import jax
import jax.numpy as jnp
from jax.experimental import pallas as pl
from jax.experimental.pallas import tpu as pltpu


# ---------------------------------------------------------------------------
# Parameter init (matches nn.init.xavier_uniform_ with relu gain, zero bias).
# ---------------------------------------------------------------------------
def xavier_uniform_relu(key, din, dout):
    gain = math.sqrt(2.0)  # calculate_gain('relu')
    bound = gain * math.sqrt(6.0 / (din + dout))
    # weight stored as (din, dout) so the kernel does x @ W
    return jax.random.uniform(key, (din, dout), jnp.float32, -bound, bound)


def make_mlp_params(key, dims):
    params = []
    for i in range(1, len(dims)):
        key, sub = jax.random.split(key)
        w = xavier_uniform_relu(sub, dims[i - 1], dims[i])
        b = jnp.zeros((1, dims[i]), jnp.float32)  # bias kept 2-D (1, dout)
        params.append((w, b))
    return key, params


# ---------------------------------------------------------------------------
# Pallas kernel: one block of Tb batch elements (all d boost groups) per step.
# ---------------------------------------------------------------------------
def make_kernel(tb, d, m, n_l, n_f, h1, compute_dtype):
    G = tb * d  # number of (batch, group) rows processed per grid step

    def kernel(*refs):
        x_ref = refs[0]                                  # (tb, n, din) point slab
        w1_ref, b1_ref = refs[1], refs[2]                # fused (din, 2*h1), (1, h1)
        idx = 3
        l_rest = refs[idx: idx + 2 * (n_l - 1)]          # remaining L layers (w, b)*
        idx += 2 * (n_l - 1)
        f_refs = refs[idx: idx + 2 * n_f]                # F layers (w, b)*
        idx += 2 * n_f
        out_ref = refs[idx]                              # (tb, f_out)

        _, n, din = x_ref.shape
        xf = x_ref[...].reshape(tb * n, din).astype(compute_dtype)

        # Fused, factored first L layer: ONE dot over the whole point slab.
        # Pair row (i, j): X[j] @ W1_top + X[i] @ W1_bot + b1 (bias folded into
        # the j-indexed half, hoisted out of the m^2 pair add).
        ac = jnp.dot(xf, w1_ref[...], preferred_element_type=jnp.float32)   # (tb*n, 2*h1)
        a = (ac[:, :h1] + b1_ref[...]).reshape(G, m, h1)                    # j-indexed
        c = ac[:, h1:].reshape(G, m, h1)                                    # i-indexed

        if n_l == 1:
            # Single (linear, no-ReLU) L layer: the j-mean commutes with it.
            pr = c + jnp.mean(a, axis=1, keepdims=True)                     # (G, m, C)
        else:
            # Materialize pair activations only at hidden width h1 (ReLU forces it).
            h = jnp.maximum(a[:, None, :, :] + c[:, :, None, :], 0.0)       # (G, i, j, h1)
            if n_l > 2:
                g = h.reshape(G * m * m, h1)
                for li in range(n_l - 2):                                   # layers 2..L-1 (ReLU'd)
                    w = l_rest[2 * li][...]
                    bias = l_rest[2 * li + 1][...]
                    g = jnp.maximum(
                        jnp.dot(g.astype(compute_dtype), w,
                                preferred_element_type=jnp.float32) + bias, 0.0)
                h = g.reshape(G, m, m, g.shape[-1])
            # Mean over j (adaptive_avg_pool3d); the final linear L layer (no
            # ReLU) commutes with the mean -> runs on G*m rows, not G*m^2.
            pm = jnp.mean(h, axis=2)                                         # (G, m, h_{L-1})
            w_last = l_rest[2 * (n_l - 2)][...]
            b_last = l_rest[2 * (n_l - 2) + 1][...]
            pr = (jnp.dot(pm.reshape(G * m, pm.shape[-1]).astype(compute_dtype),
                          w_last, preferred_element_type=jnp.float32)
                  + b_last).reshape(G, m, w_last.shape[-1])                  # (G, m, C)

        # Max over i (adaptive_max_pool2d) for all (batch, group) rows at once.
        p = jnp.max(pr, axis=1)                                              # (G, C)

        # F MLP on all Tb*d rows at once (much better MXU M than 1 row).
        y = p
        for li in range(n_f):
            w = f_refs[2 * li][...]
            bias = f_refs[2 * li + 1][...]
            y = jnp.dot(y.astype(compute_dtype), w,
                        preferred_element_type=jnp.float32) + bias
            if li < n_f - 1:
                y = jnp.maximum(y, 0.0)

        # Boost max-pool over the d groups: a single sublane reduction, one store.
        out_ref[...] = jnp.max(y.reshape(tb, d, y.shape[-1]), axis=1)

    return kernel


def _largest_divisor_at_most(x, cap):
    best = 1
    for cand in range(1, x + 1):
        if x % cand == 0 and cand <= cap:
            best = cand
    return best


# ---------------------------------------------------------------------------
# Wrapper: only X and the (small) weights are shipped; pair construction,
# pooling and both MLPs all happen inside the kernel.
# ---------------------------------------------------------------------------
def boosted_point_pair_net(X, l_params, f_params, boost_factor,
                           use_bf16_matmul=False):
    b, n, din = X.shape
    d = boost_factor
    assert n % d == 0
    m = n // d
    n_l = len(l_params)
    n_f = len(f_params)
    h1 = l_params[0][0].shape[1]
    f_out = f_params[-1][0].shape[1]
    compute_dtype = jnp.bfloat16 if use_bf16_matmul else jnp.float32

    # --- pick per-step batch block Tb --------------------------------------
    # Target >= ~256 rows in the first-layer dot while keeping the
    # (Tb*d, m, m, h_pair) pair tensor inside a conservative VMEM budget
    # (24 MiB -> safe even on v7x's 64 MiB VMEM with double-buffered inputs).
    pair_width = (max([h1] + [w.shape[1] for (w, _) in l_params[1:-1]])
                  if n_l > 1 else 0)
    cap = max(1, -(-256 // n))                       # ceil(256 / n)
    if n_l > 1 and pair_width > 0:
        cap = min(cap, max(1, (24 << 20) // max(1, d * m * m * pair_width * 4)))
    tb = _largest_divisor_at_most(b, cap)
    nb = b // tb

    # --- inputs -------------------------------------------------------------
    # Fuse the split first-layer weight into one (din, 2*h1) operand:
    # columns [0:h1] multiply X[j] ("top"), columns [h1:2*h1] multiply X[i].
    w1, b1 = l_params[0]
    w1_fused = jnp.concatenate([w1[:din], w1[din:]], axis=1).astype(compute_dtype)

    Xb = X.reshape(nb, tb, n, din).astype(compute_dtype)

    inputs = [Xb, w1_fused, b1.astype(jnp.float32)]
    in_specs = [
        pl.BlockSpec((None, tb, n, din), lambda i: (i, 0, 0, 0)),
        pl.BlockSpec(w1_fused.shape, lambda i: (0, 0)),
        pl.BlockSpec(b1.shape, lambda i: (0, 0)),
    ]
    for w, bias in l_params[1:]:
        inputs += [w.astype(compute_dtype), bias.astype(jnp.float32)]
        in_specs += [pl.BlockSpec(w.shape, lambda i: (0, 0)),
                     pl.BlockSpec(bias.shape, lambda i: (0, 0))]
    for w, bias in f_params:
        inputs += [w.astype(compute_dtype), bias.astype(jnp.float32)]
        in_specs += [pl.BlockSpec(w.shape, lambda i: (0, 0)),
                     pl.BlockSpec(bias.shape, lambda i: (0, 0))]
    # NOTE: weight/bias index maps are constant -> fetched once.  At large
    # hidden widths, pipeline_mode=pl.Buffered(1) would halve their VMEM.

    # --- VMEM budget & cost estimate ----------------------------------------
    op_bytes = 2 if use_bf16_matmul else 4
    w_bytes = sum(w.size * op_bytes + bias.size * 4
                  for (w, bias) in (l_params + f_params))
    x_blk_bytes = tb * n * din * op_bytes
    pair_bytes = (tb * d * m * m * pair_width * 4) if n_l > 1 else 0
    max_width = max([2 * h1, f_out] + [w.shape[1] for (w, _) in l_params + f_params])
    act_bytes = 4 * tb * n * max_width * 4
    footprint = 2 * (x_blk_bytes + w_bytes) + 3 * (pair_bytes + act_bytes) + (1 << 20)
    vmem_limit = int(min(max(footprint, 32 << 20), 100 << 20))

    flops = 2 * b * n * din * (2 * h1)                      # fused first layer
    for li in range(1, n_l - 1):                            # middle layers at m^2 rows
        w = l_params[li][0]
        flops += 2 * b * d * m * m * w.shape[0] * w.shape[1]
    if n_l > 1:                                             # commuted last L layer
        w = l_params[-1][0]
        flops += 2 * b * d * m * w.shape[0] * w.shape[1]
    for (w, _) in f_params:
        flops += 2 * b * d * w.shape[0] * w.shape[1]
    bytes_accessed = b * n * din * op_bytes + w_bytes + b * f_out * 4
    cost = pl.CostEstimate(flops=int(flops), transcendentals=0,
                           bytes_accessed=int(bytes_accessed))

    kernel = make_kernel(tb, d, m, n_l, n_f, h1, compute_dtype)

    out3 = pl.pallas_call(
        kernel,
        out_shape=jax.ShapeDtypeStruct((nb, tb, f_out), jnp.float32),
        grid_spec=pltpu.PrefetchScalarGridSpec(
            num_scalar_prefetch=0,
            grid=(nb,),
            in_specs=in_specs,
            out_specs=pl.BlockSpec((None, tb, f_out), lambda i: (i, 0, 0)),
        ),
        compiler_params=pltpu.CompilerParams(
            dimension_semantics=("parallel",),
            vmem_limit_bytes=vmem_limit),
        cost_estimate=cost,
    )(*inputs)
    return out3.reshape(b, f_out)


# ---------------------------------------------------------------------------
# Pure-JAX reference (mirrors the PyTorch module) for verification.
# ---------------------------------------------------------------------------
def reference(X, l_params, f_params, boost_factor):
    b, n, din = X.shape
    d = boost_factor
    m = n // d

    def mlp(z, params):
        for i, (w, bias) in enumerate(params):
            z = z @ w + bias[0]
            if i < len(params) - 1:
                z = jnp.maximum(z, 0.0)
        return z

    Xg = X.reshape(b, d, m, din)
    Xj = jnp.broadcast_to(Xg[:, :, None, :, :], (b, d, m, m, din))
    Xi = jnp.broadcast_to(Xg[:, :, :, None, :], (b, d, m, m, din))
    Z = jnp.concatenate([Xj, Xi], axis=-1)
    G = mlp(Z, l_params)
    Pr = jnp.mean(G, axis=3)      # avg over j
    P = jnp.max(Pr, axis=2)       # max over i
    Y = mlp(P, f_params)
    return jnp.max(Y, axis=1)     # boost max pool


if __name__ == "__main__":
    # Small shapes consistent with the module (m = n // d = 8 -> sublane aligned).
    b, n, din = 2, 16, 4
    boost_factor = 2                      # d
    dims = [2 * din, 32, 16]              # L-MLP dims (dims[0] = 2*din)
    fc_dims = [16, 32, 8]                 # F-MLP dims (dims[-1] == FC_dims[0])

    key = jax.random.PRNGKey(0)
    key, l_params = make_mlp_params(key, dims)
    key, f_params = make_mlp_params(key, fc_dims)
    key, xkey = jax.random.split(key)
    X = jax.random.normal(xkey, (b, n, din), jnp.float32)

    # f32 path: exact check against the reference.
    out = boosted_point_pair_net(X, l_params, f_params, boost_factor)
    out = jax.block_until_ready(out)

    ref = reference(X, l_params, f_params, boost_factor)
    assert out.shape == (b, fc_dims[-1])
    assert jnp.allclose(out, ref, rtol=1e-4, atol=1e-5), (out, ref)

    # bf16 MXU-operand path (v6e/v7x throughput lever): loose tolerance.
    out_bf16 = jax.block_until_ready(
        boosted_point_pair_net(X, l_params, f_params, boost_factor,
                               use_bf16_matmul=True))
    assert out_bf16.shape == (b, fc_dims[-1])
    assert bool(jnp.all(jnp.isfinite(out_bf16)))
    assert jnp.allclose(out_bf16, ref, rtol=1e-1, atol=1e-1), (out_bf16, ref)

    print("KERNEL_OK")
</pallas_src>

<mosaic_0001>
module attributes {stable_mosaic.version = 11 : i64} {
  func.func @kernel(%arg0: i32, %arg1: memref<1x2x16x4xf32, #tpu.memory_space<vmem>>, %arg2: memref<4x64xf32, #tpu.memory_space<vmem>>, %arg3: memref<1x32xf32, #tpu.memory_space<vmem>>, %arg4: memref<32x16xf32, #tpu.memory_space<vmem>>, %arg5: memref<1x16xf32, #tpu.memory_space<vmem>>, %arg6: memref<16x32xf32, #tpu.memory_space<vmem>>, %arg7: memref<1x32xf32, #tpu.memory_space<vmem>>, %arg8: memref<32x8xf32, #tpu.memory_space<vmem>>, %arg9: memref<1x8xf32, #tpu.memory_space<vmem>>, %arg10: memref<1x2x8xf32, #tpu.memory_space<vmem>>) attributes {dimension_semantics = [#tpu.dimension_semantics<parallel>], iteration_bounds = array<i64: 1>, scalar_prefetch = 0 : i64, scratch_operands = 0 : i64, tpu.core_type = #tpu.core_type<tc>, window_params = [{transform_indices = @transform_0, window_bounds = array<i64: 1, 2, 16, 4>}, {pipeline_mode = #tpu.pipeline_mode<synchronous>, transform_indices = @transform_1, window_bounds = array<i64: 4, 64>}, {pipeline_mode = #tpu.pipeline_mode<synchronous>, transform_indices = @transform_2, window_bounds = array<i64: 1, 32>}, {pipeline_mode = #tpu.pipeline_mode<synchronous>, transform_indices = @transform_3, window_bounds = array<i64: 32, 16>}, {pipeline_mode = #tpu.pipeline_mode<synchronous>, transform_indices = @transform_4, window_bounds = array<i64: 1, 16>}, {pipeline_mode = #tpu.pipeline_mode<synchronous>, transform_indices = @transform_5, window_bounds = array<i64: 16, 32>}, {pipeline_mode = #tpu.pipeline_mode<synchronous>, transform_indices = @transform_6, window_bounds = array<i64: 1, 32>}, {pipeline_mode = #tpu.pipeline_mode<synchronous>, transform_indices = @transform_7, window_bounds = array<i64: 32, 8>}, {pipeline_mode = #tpu.pipeline_mode<synchronous>, transform_indices = @transform_8, window_bounds = array<i64: 1, 8>}, {transform_indices = @transform_9, window_bounds = array<i64: 1, 2, 8>}]} {
    %c0 = arith.constant 0 : index
    %c0_0 = arith.constant 0 : index
    %c0_1 = arith.constant 0 : index
    %c0_2 = arith.constant 0 : index
    %0 = vector.load %arg1[%c0, %c0_0, %c0_1, %c0_2] : memref<1x2x16x4xf32, #tpu.memory_space<vmem>>, vector<1x2x16x4xf32>
    %1 = vector.shape_cast %0 : vector<1x2x16x4xf32> to vector<2x16x4xf32>
    %2 = vector.shape_cast %1 : vector<2x16x4xf32> to vector<32x4xf32>
    %c0_3 = arith.constant 0 : index
    %c0_4 = arith.constant 0 : index
    %3 = vector.load %arg2[%c0_3, %c0_4] : memref<4x64xf32, #tpu.memory_space<vmem>>, vector<4x64xf32>
    %cst = arith.constant dense<0.000000e+00> : vector<32x64xf32>
    %4 = tpu.matmul %2, %3, %cst {dimension_numbers = #tpu.dot_dimension_numbers<[1], [0], [0], [1], [0, 0, 1, 1], [], []>} : vector<32x4xf32>, vector<4x64xf32>, vector<32x64xf32> -> vector<32x64xf32>
    %5 = vector.extract_strided_slice %4 {offsets = [0, 0], sizes = [32, 32], strides = [1, 1]} : vector<32x64xf32> to vector<32x32xf32>
    %c0_5 = arith.constant 0 : index
    %c0_6 = arith.constant 0 : index
    %6 = vector.load %arg3[%c0_5, %c0_6] : memref<1x32xf32, #tpu.memory_space<vmem>>, vector<1x32xf32>
    %7 = vector.broadcast %6 : vector<1x32xf32> to vector<32x32xf32>
    %8 = arith.addf %5, %7 : vector<32x32xf32>
    %9 = vector.shape_cast %8 : vector<32x32xf32> to vector<4x8x32xf32>
    %10 = vector.extract_strided_slice %4 {offsets = [0, 32], sizes = [32, 32], strides = [1, 1]} : vector<32x64xf32> to vector<32x32xf32>
    %11 = vector.shape_cast %10 : vector<32x32xf32> to vector<4x8x32xf32>
    %12 = vector.shape_cast %9 : vector<4x8x32xf32> to vector<4x1x8x32xf32>
    %13 = vector.shape_cast %11 : vector<4x8x32xf32> to vector<4x8x1x32xf32>
    %14 = vector.broadcast %12 : vector<4x1x8x32xf32> to vector<4x8x8x32xf32>
    %15 = vector.broadcast %13 : vector<4x8x1x32xf32> to vector<4x8x8x32xf32>
    %16 = arith.addf %14, %15 : vector<4x8x8x32xf32>
    %cst_7 = arith.constant 0.000000e+00 : f32
    %17 = vector.broadcast %cst_7 : f32 to vector<4x8x8x32xf32>
    %18 = arith.maximumf %16, %17 : vector<4x8x8x32xf32>
    %cst_8 = arith.constant dense<0.000000e+00> : vector<4x8x32xf32>
    %19 = vector.multi_reduction <add>, %18, %cst_8 [2] : vector<4x8x8x32xf32> to vector<4x8x32xf32>
    %cst_9 = arith.constant 8.000000e+00 : f32
    %20 = vector.broadcast %cst_9 : f32 to vector<4x8x32xf32>
    %21 = arith.divf %19, %20 : vector<4x8x32xf32>
    %c0_10 = arith.constant 0 : index
    %c0_11 = arith.constant 0 : index
    %22 = vector.load %arg4[%c0_10, %c0_11] : memref<32x16xf32, #tpu.memory_space<vmem>>, vector<32x16xf32>
    %c0_12 = arith.constant 0 : index
    %c0_13 = arith.constant 0 : index
    %23 = vector.load %arg5[%c0_12, %c0_13] : memref<1x16xf32, #tpu.memory_space<vmem>>, vector<1x16xf32>
    %24 = vector.shape_cast %21 : vector<4x8x32xf32> to vector<32x32xf32>
    %cst_14 = arith.constant dense<0.000000e+00> : vector<32x16xf32>
    %25 = tpu.matmul %24, %22, %cst_14 {dimension_numbers = #tpu.dot_dimension_numbers<[1], [0], [0], [1], [0, 0, 1, 1], [], []>} : vector<32x32xf32>, vector<32x16xf32>, vector<32x16xf32> -> vector<32x16xf32>
    %26 = vector.broadcast %23 : vector<1x16xf32> to vector<32x16xf32>
    %27 = arith.addf %25, %26 : vector<32x16xf32>
    %28 = vector.shape_cast %27 : vector<32x16xf32> to vector<4x8x16xf32>
    %cst_15 = arith.constant dense<0xFF800000> : vector<4x16xf32>
    %29 = vector.multi_reduction <maximumf>, %28, %cst_15 [1] : vector<4x8x16xf32> to vector<4x16xf32>
    %c0_16 = arith.constant 0 : index
    %c0_17 = arith.constant 0 : index
    %30 = vector.load %arg6[%c0_16, %c0_17] : memref<16x32xf32, #tpu.memory_space<vmem>>, vector<16x32xf32>
    %c0_18 = arith.constant 0 : index
    %c0_19 = arith.constant 0 : index
    %31 = vector.load %arg7[%c0_18, %c0_19] : memref<1x32xf32, #tpu.memory_space<vmem>>, vector<1x32xf32>
    %cst_20 = arith.constant dense<0.000000e+00> : vector<4x32xf32>
    %32 = tpu.matmul %29, %30, %cst_20 {dimension_numbers = #tpu.dot_dimension_numbers<[1], [0], [0], [1], [0, 0, 1, 1], [], []>} : vector<4x16xf32>, vector<16x32xf32>, vector<4x32xf32> -> vector<4x32xf32>
    %33 = vector.broadcast %31 : vector<1x32xf32> to vector<4x32xf32>
    %34 = arith.addf %32, %33 : vector<4x32xf32>
    %cst_21 = arith.constant 0.000000e+00 : f32
    %35 = vector.broadcast %cst_21 : f32 to vector<4x32xf32>
    %36 = arith.maximumf %34, %35 : vector<4x32xf32>
    %c0_22 = arith.constant 0 : index
    %c0_23 = arith.constant 0 : index
    %37 = vector.load %arg8[%c0_22, %c0_23] : memref<32x8xf32, #tpu.memory_space<vmem>>, vector<32x8xf32>
    %c0_24 = arith.constant 0 : index
    %c0_25 = arith.constant 0 : index
    %38 = vector.load %arg9[%c0_24, %c0_25] : memref<1x8xf32, #tpu.memory_space<vmem>>, vector<1x8xf32>
    %cst_26 = arith.constant dense<0.000000e+00> : vector<4x8xf32>
    %39 = tpu.matmul %36, %37, %cst_26 {dimension_numbers = #tpu.dot_dimension_numbers<[1], [0], [0], [1], [0, 0, 1, 1], [], []>} : vector<4x32xf32>, vector<32x8xf32>, vector<4x8xf32> -> vector<4x8xf32>
    %40 = vector.broadcast %38 : vector<1x8xf32> to vector<4x8xf32>
    %41 = arith.addf %39, %40 : vector<4x8xf32>
    %42 = vector.shape_cast %41 : vector<4x8xf32> to vector<2x2x8xf32>
    %cst_27 = arith.constant dense<0xFF800000> : vector<2x8xf32>
    %43 = vector.multi_reduction <maximumf>, %42, %cst_27 [1] : vector<2x2x8xf32> to vector<2x8xf32>
    %c0_28 = arith.constant 0 : index
    %c0_29 = arith.constant 0 : index
    %c0_30 = arith.constant 0 : index
    %44 = vector.load %arg10[%c0_28, %c0_29, %c0_30] : memref<1x2x8xf32, #tpu.memory_space<vmem>>, vector<1x2x8xf32>
    %45 = vector.shape_cast %44 : vector<1x2x8xf32> to vector<2x8xf32>
    %46 = vector.shape_cast %43 : vector<2x8xf32> to vector<1x2x8xf32>
    tpu.vector_store %arg10[%c0_28, %c0_29, %c0_30], %46 {strides = array<i32>} : memref<1x2x8xf32, #tpu.memory_space<vmem>>, vector<1x2x8xf32>,
    return
  }
  func.func @transform_0(%arg0: i32) -> (i32, i32, i32, i32) {
    %c0_i32 = arith.constant 0 : i32
    %c0_i32_0 = arith.constant 0 : i32
    %c0_i32_1 = arith.constant 0 : i32
    %c0_i32_2 = arith.constant 0 : i32
    return %arg0, %c0_i32, %c0_i32_0, %c0_i32_1 : i32, i32, i32, i32
  }
  func.func @transform_1(%arg0: i32) -> (i32, i32) {
    %c0_i32 = arith.constant 0 : i32
    %c0_i32_0 = arith.constant 0 : i32
    %c0_i32_1 = arith.constant 0 : i32
    return %c0_i32, %c0_i32_0 : i32, i32
  }
  func.func @transform_2(%arg0: i32) -> (i32, i32) {
    %c0_i32 = arith.constant 0 : i32
    %c0_i32_0 = arith.constant 0 : i32
    %c0_i32_1 = arith.constant 0 : i32
    return %c0_i32, %c0_i32_0 : i32, i32
  }
  func.func @transform_3(%arg0: i32) -> (i32, i32) {
    %c0_i32 = arith.constant 0 : i32
    %c0_i32_0 = arith.constant 0 : i32
    %c0_i32_1 = arith.constant 0 : i32
    return %c0_i32, %c0_i32_0 : i32, i32
  }
  func.func @transform_4(%arg0: i32) -> (i32, i32) {
    %c0_i32 = arith.constant 0 : i32
    %c0_i32_0 = arith.constant 0 : i32
    %c0_i32_1 = arith.constant 0 : i32
    return %c0_i32, %c0_i32_0 : i32, i32
  }
  func.func @transform_5(%arg0: i32) -> (i32, i32) {
    %c0_i32 = arith.constant 0 : i32
    %c0_i32_0 = arith.constant 0 : i32
    %c0_i32_1 = arith.constant 0 : i32
    return %c0_i32, %c0_i32_0 : i32, i32
  }
  func.func @transform_6(%arg0: i32) -> (i32, i32) {
    %c0_i32 = arith.constant 0 : i32
    %c0_i32_0 = arith.constant 0 : i32
    %c0_i32_1 = arith.constant 0 : i32
    return %c0_i32, %c0_i32_0 : i32, i32
  }
  func.func @transform_7(%arg0: i32) -> (i32, i32) {
    %c0_i32 = arith.constant 0 : i32
    %c0_i32_0 = arith.constant 0 : i32
    %c0_i32_1 = arith.constant 0 : i32
    return %c0_i32, %c0_i32_0 : i32, i32
  }
  func.func @transform_8(%arg0: i32) -> (i32, i32) {
    %c0_i32 = arith.constant 0 : i32
    %c0_i32_0 = arith.constant 0 : i32
    %c0_i32_1 = arith.constant 0 : i32
    return %c0_i32, %c0_i32_0 : i32, i32
  }
  func.func @transform_9(%arg0: i32) -> (i32, i32, i32) {
    %c0_i32 = arith.constant 0 : i32
    %c0_i32_0 = arith.constant 0 : i32
    %c0_i32_1 = arith.constant 0 : i32
    return %arg0, %c0_i32, %c0_i32_0 : i32, i32, i32
  }
}

</mosaic_0001>

<bundles_post_ra>
// kernel: tpu_custom_call.1
= control target key start
LH: loop header
LB: loop body
LE: loop exit
PB: predicated region body
PF: predicated region fallthrough
CT: control target
= control target key end

     0   :  { %vm51_vm0 = vcmask 1043456   ;;  %vm38_vm1 = vcmask 31744   ;;  %s1234_s0 = inlined_call_operand.vmem [shape: f32[1,2,16,4], index: 0, kind: input, shape index: {}]   ;;  %s1235_s1 = inlined_call_operand.vmem [shape: f32[4,64], index: 1, kind: input, shape index: {}]   ;;  %s1236_s2 = inlined_call_operand.vmem [shape: f32[1,32], index: 2, kind: input, shape index: {}]   ;;  %s1237_s3 = inlined_call_operand.vmem [shape: f32[32,16], index: 3, kind: input, shape index: {}]   ;;  %s1238_s4 = inlined_call_operand.vmem [shape: f32[1,16], index: 4, kind: input, shape index: {}]   ;;  %s1239_s5 = inlined_call_operand.vmem [shape: f32[16,32], index: 5, kind: input, shape index: {}]   ;;  %s1240_s6 = inlined_call_operand.vmem [shape: f32[1,32], index: 6, kind: input, shape index: {}]   ;;  %s1241_s7 = inlined_call_operand.vmem [shape: f32[32,8], index: 7, kind: input, shape index: {}]   ;;  %s1242_s8 = inlined_call_operand.vmem [shape: f32[1,8], index: 8, kind: input, shape index: {}]   ;;  %s1243_s9 = inlined_call_operand.hbm [shape: f32[1,2,8], index: 9, kind: output, shape index: {}]  }
   0x1   :  { %v37_v0 = vld [vmem:[%s1235_s1] sm:$0xf]  ;;  %v36_v2 = vld [vmem:[%s1234_s0 + $0x18] sm:$0xff] }
   0x2   :  { %v33_v1 = vld [vmem:[%s1234_s0] sm:$0xff]  ;;  %827 = vmatpush.msk.msra.mxu0 %vm51_vm0, %v37_v0  ;;  %838 = vmatpush.msk.msra.mxu3 %vm51_vm0, %v37_v0 }
   0x3   :  { %828 = vmatmul.msk.f32.vlgmr.msra.gmra.mxu0 %vm38_vm1, %v33_v1  ;;  %831 = vmatmul.msk.f32.vlgmr.msra.gmra.mxu3 %vm38_vm1, %v36_v2 }
   0x4   :  { %14 = vsyncpa [#allocation3], 0  ;;  %v34_v3 = vld [vmem:[%s1234_s0 + $0x8] sm:$0xff]  ;;  %v35_v4 = vld [vmem:[%s1234_s0 + $0x10] sm:$0xff]  ;;  %s878_s18 = smov 96   ;;  %vm316_vm2 = vcmask 261120  }
   0x5   :  { %vm620_vm4 = vcmask 1041409   ;;  %vm622_vm5 = vcmask 1042434   ;;  %vm624_vm6 = vcmask 1043459   ;;  %vm626_vm7 = vcmask 1044484  }
   0x6   :  { %vm628_vm8 = vcmask 1045509   ;;  %vm630_vm9 = vcmask 1046534   ;;  %vm632_vm10 = vcmask 1047559   ;;  %vm692_vm11 = vcmask 130048  }
   0x7   :  { %vm791_vm12 = vcmask 58368  }
   0xb   :  { %829 = vmatmul.msk.f32.gmra.mxu0 %vm38_vm1, %v34_v3 }
  0x13   :  { %830 = vmatmul.msk.f32.gmra.mxu0 %vm38_vm1, %v35_v4 }
  0x80   :  { %v946_v5 = vpop.f32.mrf.mxu0 }
  0x81   :  { %v124_v6 = vperm.slane %v946_v5, 0  ;;  %v99_v7 = vrot.slane %v946_v5, 4  ;;  %v97_v8 = vrot.slane %v946_v5, 2  ;;  %v96_v11 = vrot.slane %v946_v5, 1 }
  0x82   :  { %v100_v12 = vrot.slane %v946_v5, 5  ;;  %v98_v13 = vrot.slane %v946_v5, 3  ;;  %v101_v17 = vrot.slane %v946_v5, 6  ;;  %v102_v19 = vrot.slane %v946_v5, 7 }
  0x83   :  { %156 = vrot.lane.b32.xlu0 %v124_v6, %s878_s18  ;;  %v128_v9 = vperm.slane %v99_v7, 0  ;;  %v126_v10 = vperm.slane %v97_v8, 0  ;;  %v125_v14 = vperm.slane %v96_v11, 0  ;;  %v1021_v6 = vld [vmem:[%s1236_s2] ss:$0 sm:$0xff]  ;;  %s818_s2 = sshll.u32 %s1243_s9, 4  ;;  %s819_s2 = int_to_ptr.hbm [resolvable:$true] %s818_s2 }
  0x84   :  { %v129_v15 = vperm.slane %v100_v12, 0  ;;  %v127_v16 = vperm.slane %v98_v13, 0  ;;  %v130_v21 = vperm.slane %v101_v17, 0  ;;  %v131_v23 = vperm.slane %v102_v19, 0 }
  0x85   :  { %164 = vrot.lane.b32.xlu2 %v128_v9, %s878_s18  ;;  %160 = vrot.lane.b32.xlu1 %v126_v10, %s878_s18  ;;  %v1025_v8 = vadd.f32 %v1021_v6, %v946_v5  ;;  %v879_v12 = vmov 8.0  }
  0x86   :  { %v964_v20 = vpop.f32.mrf.mxu3  ;;  %850 = vrcp.f32 %v879_v12 }
  0x87   :  { %v119_v24 = vrot.slane %v964_v20, 3  ;;  %v117_v25 = vrot.slane %v964_v20, 1  ;;  %v148_v28 = vperm.slane %v964_v20, 0  ;;  %v121_v29 = vrot.slane %v964_v20, 5 }
  0x88   :  { %v961_v18 = vpop.f32.mrf.mxu0  ;;  %v118_v30 = vrot.slane %v964_v20, 2  ;;  %v120_v31 = vrot.slane %v964_v20, 4  ;;  %v122_v35 = vrot.slane %v964_v20, 6  ;;  %v123_v37 = vrot.slane %v964_v20, 7 }
  0x89   :  { %v132_v22 = vperm.slane %v961_v18, 0  ;;  %v151_v26 = vperm.slane %v119_v24, 0  ;;  %v149_v27 = vperm.slane %v117_v25, 0  ;;  %v153_v32 = vperm.slane %v121_v29, 0 }
  0x8a   :  { %v150_v33 = vperm.slane %v118_v30, 0  ;;  %v152_v34 = vperm.slane %v120_v31, 0  ;;  %v104_v36 = vrot.slane %v961_v18, 2  ;;  %v154_v38 = vperm.slane %v122_v35, 0  ;;  %v582_v35 = vld [vmem:[%s1237_s3 + $0x10] sm:$0xff] }
  0x8b   :  { %158 = vrot.lane.b32.xlu0 %v125_v14, %s878_s18  ;;  %v155_v40 = vperm.slane %v123_v37, 0  ;;  %v103_v41 = vrot.slane %v961_v18, 1  ;;  %v105_v42 = vrot.slane %v961_v18, 3  ;;  %v109_v43 = vrot.slane %v961_v18, 7 }
  0x8c   :  { %v134_v39 = vperm.slane %v104_v36, 0  ;;  %v106_v47 = vrot.slane %v961_v18, 4  ;;  %v108_v49 = vrot.slane %v961_v18, 6  ;;  %v107_v53 = vrot.slane %v961_v18, 5  ;;  %v851_v19 = vpop.eup %850 }
  0x8d   :  { %166 = vrot.lane.b32.xlu2 %v129_v15, %s878_s18  ;;  %162 = vrot.lane.b32.xlu1 %v127_v16, %s878_s18  ;;  %v133_v44 = vperm.slane %v103_v41, 0  ;;  %v135_v45 = vperm.slane %v105_v42, 0  ;;  %v139_v46 = vperm.slane %v109_v43, 0  ;;  %v1042_v36 = vadd.f32 %v1021_v6, %v964_v20  ;;  %v581_v43 = vld [vmem:[%s1237_s3 + $0x8] sm:$0xff] }
  0x8e   :  { %v136_v50 = vperm.slane %v106_v47, 0  ;;  %v138_v52 = vperm.slane %v108_v49, 0  ;;  %v137_v56 = vperm.slane %v107_v53, 0  ;;  %vm546_vm3 = vweird.f32 %v851_v19 }
  0x90   :  { %v995_v48 = vpop.f32.mrf.mxu0 }
  0x91   :  { %v140_v51 = vperm.slane %v995_v48, 0  ;;  %v111_v54 = vrot.slane %v995_v48, 2  ;;  %v110_v55 = vrot.slane %v995_v48, 1  ;;  %v112_v59 = vrot.slane %v995_v48, 3 }
  0x92   :  { %v113_v60 = vrot.slane %v995_v48, 4  ;;  %v114_v61 = vrot.slane %v995_v48, 5  ;;  %v115_v1 = vrot.slane %v995_v48, 6  ;;  %v116_v2 = vrot.slane %v995_v48, 7 }
  0x93   :  { %168 = vrot.lane.b32.xlu0 %v130_v21, %s878_s18  ;;  %v142_v57 = vperm.slane %v111_v54, 0  ;;  %v141_v58 = vperm.slane %v110_v55, 0  ;;  %v143_v62 = vperm.slane %v112_v59, 0 }
  0x94   :  { %v144_v63 = vperm.slane %v113_v60, 0  ;;  %v145_v0 = vperm.slane %v114_v61, 0  ;;  %v146_v3 = vperm.slane %v115_v1, 0  ;;  %v147_v4 = vperm.slane %v116_v2, 0 }
  0x95   :  { %170 = vrot.lane.b32.xlu1 %v131_v23, %s878_s18  ;;  %172 = vrot.lane.b32.xlu2 %v132_v22, %s878_s18  ;;  %v542_v22 = vmul.f32 8.0, %v851_v19 }
  0x97   :  { %v543_v29 = vsub.f32 1.0, %v542_v22 }
  0x99   :  { %v544_v41 = vmul.f32 %v851_v19, %v543_v29 }
  0x9b   :  { %210 = vrot.lane.b32.xlu0 %v151_v26, %s878_s18 }
  0x9d   :  { %204 = vrot.lane.b32.xlu1 %v148_v28, %s878_s18  ;;  %206 = vrot.lane.b32.xlu2 %v149_v27, %s878_s18 }
  0xa3   :  { %214 = vrot.lane.b32.xlu0 %v153_v32, %s878_s18  ;;  %v583_v32 = vld [vmem:[%s1237_s3 + $0x18] sm:$0xff] }
  0xa4   :  { %675 = vmatpush.msra.mxu1 %v583_v32  ;;  %839 = vmatpush.msra.mxu2 %v583_v32 }
  0xa5   :  { %208 = vrot.lane.b32.xlu1 %v150_v33, %s878_s18  ;;  %212 = vrot.lane.b32.xlu2 %v152_v34, %s878_s18 }
  0xa6   :  { %676 = vmatpush.msra.mxu1 %v582_v35  ;;  %840 = vmatpush.msra.mxu2 %v582_v35 }
  0xa8   :  { %677 = vmatpush.msra.mxu1 %v581_v43  ;;  %841 = vmatpush.msra.mxu2 %v581_v43 }
  0xab   :  { %216 = vrot.lane.b32.xlu0 %v154_v38, %s878_s18 }
  0xad   :  { %218 = vrot.lane.b32.xlu2 %v155_v40, %s878_s18  ;;  %176 = vrot.lane.b32.xlu1 %v134_v39, %s878_s18  ;;  %v1046_v40 = vadd.f32 %v1021_v6, %v961_v18  ;;  %v580_v18 = vld [vmem:[%s1237_s3] sm:$0xff] }
  0xae   :  { %678 = vmatpush.msra.mxu1 %v580_v18  ;;  %842 = vmatpush.msra.mxu2 %v580_v18 }
  0xb3   :  { %174 = vrot.lane.b32.xlu0 %v133_v44, %s878_s18 }
  0xb5   :  { %178 = vrot.lane.b32.xlu2 %v135_v45, %s878_s18  ;;  %186 = vrot.lane.b32.xlu1 %v139_v46, %s878_s18 }
  0xbb   :  { %180 = vrot.lane.b32.xlu0 %v136_v50, %s878_s18 }
  0xbd   :  { %184 = vrot.lane.b32.xlu2 %v138_v52, %s878_s18  ;;  %188 = vrot.lane.b32.xlu1 %v140_v51, %s878_s18 }
  0xc3   :  { %182 = vrot.lane.b32.xlu0 %v137_v56, %s878_s18  ;;  %v545_v56 = vadd.f32 %v851_v19, %v544_v41 }
  0xc5   :  { %192 = vrot.lane.b32.xlu1 %v142_v57, %s878_s18  ;;  %190 = vrot.lane.b32.xlu2 %v141_v58, %s878_s18 }
  0xcb   :  { %194 = vrot.lane.b32.xlu0 %v143_v62, %s878_s18 }
  0xcd   :  { %196 = vrot.lane.b32.xlu1 %v144_v63, %s878_s18  ;;  %198 = vrot.lane.b32.xlu2 %v145_v0, %s878_s18 }
  0xd3   :  { %200 = vrot.lane.b32.xlu0 %v146_v3, %s878_s18 }
  0xd5   :  { %202 = vrot.lane.b32.xlu1 %v147_v4, %s878_s18 }
  0xdf   :  { %v165_v7 = vpop.permute.xlu2 %164 }
  0xe0   :  { %v256_v9 = vadd.f32 %v165_v7, %v1025_v8  ;;  %v1061_v7 = vsel %vm546_vm3, %v851_v19, %v545_v56 }
  0xe2   :  { %v288_v11 = vmax.f32 %v256_v9, 0.0 }
  0xe4   :  { %v345_v13 = vsel %vm316_vm2, %v288_v11, 0.0 }
  0xe5   :  { %v346_v15 = vrot.slane %v345_v13, 4 }
  0xe7   :  { %v167_v10 = vpop.permute.xlu2 %166  ;;  %v347_v21 = vadd.f32 %v346_v15, %v345_v13 }
  0xe8   :  { %v257_v14 = vadd.f32 %v167_v10, %v1025_v8 }
  0xe9   :  { %v348_v25 = vrot.slane %v347_v21, 2 }
  0xea   :  { %v289_v17 = vmax.f32 %v257_v14, 0.0 }
  0xeb   :  { %v349_v37 = vadd.f32 %v348_v25, %v347_v21 }
  0xec   :  { %v352_v5 = vsel %vm316_vm2, %v289_v17, 0.0 }
  0xed   :  { %v353_v26 = vrot.slane %v352_v5, 4  ;;  %v350_v50 = vrot.slane %v349_v37, 1 }
  0xef   :  { %v173_v16 = vpop.permute.xlu2 %172  ;;  %v354_v38 = vadd.f32 %v353_v26, %v352_v5  ;;  %v351_v1 = vadd.f32 %v350_v50, %v349_v37 }
  0xf0   :  { %v260_v47 = vadd.f32 %v173_v16, %v1046_v40 }
  0xf1   :  { %v355_v51 = vrot.slane %v354_v38, 2  ;;  %v1068_v21 = vmul.f32 %v1061_v7, %v351_v1 }
  0xf2   :  { %v292_v62 = vmax.f32 %v260_v47, 0.0 }
  0xf3   :  { %v356_v2 = vadd.f32 %v355_v51, %v354_v38 }
  0xf4   :  { %v373_v15 = vsel %vm316_vm2, %v292_v62, 0.0 }
  0xf5   :  { %v157_v23 = vpop.permute.xlu0 %156  ;;  %v357_v22 = vrot.slane %v356_v2, 1  ;;  %v374_v29 = vrot.slane %v373_v15, 4 }
  0xf6   :  { %v252_v24 = vadd.f32 %v157_v23, %v1025_v8 }
  0xf7   :  { %v161_v27 = vpop.permute.xlu1 %160  ;;  %v207_v28 = vpop.permute.xlu2 %206 }
  0xf8   :  { %v284_v30 = vmax.f32 %v252_v24, 0.0  ;;  %v254_v31 = vadd.f32 %v161_v27, %v1025_v8  ;;  %v277_v20 = vadd.f32 %v207_v28, %v1042_v36 }
  0xfa   :  { %v317_v33 = vsel %vm316_vm2, %v284_v30, 0.0  ;;  %v286_v34 = vmax.f32 %v254_v31, 0.0  ;;  %v309_v60 = vmax.f32 %v277_v20, 0.0 }
  0xfb   :  { %v318_v39 = vrot.slane %v317_v33, 4 }
  0xfc   :  { %v331_v42 = vsel %vm316_vm2, %v286_v34, 0.0  ;;  %v492_v11 = vsel %vm316_vm2, %v309_v60, 0.0 }
  0xfd   :  { %v319_v44 = vadd.f32 %v318_v39, %v317_v33  ;;  %v332_v45 = vrot.slane %v331_v42, 4  ;;  %v159_v46 = vpop.permute.xlu0 %158  ;;  %v493_v25 = vrot.slane %v492_v11, 4 }
  0xfe   :  { %v253_v49 = vadd.f32 %v159_v46, %v1025_v8 }
  0xff   :  { %v320_v52 = vrot.slane %v319_v44, 2  ;;  %v333_v53 = vadd.f32 %v332_v45, %v331_v42  ;;  %v163_v54 = vpop.permute.xlu1 %162  ;;  %v213_v55 = vpop.permute.xlu2 %212  ;;  %v494_v42 = vadd.f32 %v493_v25, %v492_v11 }
 0x100   :  { %v285_v57 = vmax.f32 %v253_v49, 0.0  ;;  %v255_v58 = vadd.f32 %v163_v54, %v1025_v8  ;;  %v280_v61 = vadd.f32 %v213_v55, %v1042_v36 }
 0x101   :  { %v334_v59 = vrot.slane %v333_v53, 2  ;;  %v321_v3 = vadd.f32 %v320_v52, %v319_v44 }
 0x102   :  { %v324_v63 = vsel %vm316_vm2, %v285_v57, 0.0  ;;  %v287_v0 = vmax.f32 %v255_v58, 0.0  ;;  %v312_v13 = vmax.f32 %v280_v61, 0.0  ;;  %v358_v58 = vadd.f32 %v357_v22, %v356_v2 }
 0x103   :  { %v325_v4 = vrot.slane %v324_v63, 4  ;;  %v335_v10 = vadd.f32 %v334_v59, %v333_v53  ;;  %v322_v19 = vrot.slane %v321_v3, 1  ;;  %v495_v59 = vrot.slane %v494_v42, 2 }
 0x104   :  { %v338_v9 = vsel %vm316_vm2, %v287_v0, 0.0  ;;  %v513_v32 = vsel %vm316_vm2, %v312_v13, 0.0 }
 0x105   :  { %v326_v12 = vadd.f32 %v325_v4, %v324_v63  ;;  %v169_v14 = vpop.permute.xlu0 %168  ;;  %v339_v16 = vrot.slane %v338_v9, 4  ;;  %v336_v30 = vrot.slane %v335_v10, 1  ;;  %v323_v38 = vadd.f32 %v322_v19, %v321_v3 }
 0x106   :  { %v258_v17 = vadd.f32 %v169_v14, %v1025_v8  ;;  %v514_v45 = vrot.slane %v513_v32, 4  ;;  %v375_v3 = vadd.f32 %v374_v29, %v373_v15  ;;  %v553_v14 = vmul.f32 %v1061_v7, %v358_v58 }
 0x107   :  { %v327_v5 = vrot.slane %v326_v12, 2  ;;  %v171_v23 = vpop.permute.xlu1 %170  ;;  %v219_v24 = vpop.permute.xlu2 %218  ;;  %v340_v26 = vadd.f32 %v339_v16, %v338_v9  ;;  %v337_v49 = vadd.f32 %v336_v30, %v335_v10  ;;  %v548_v52 = vmul.f32 %v1061_v7, %v323_v38 }
 0x108   :  { %v290_v27 = vmax.f32 %v258_v17, 0.0  ;;  %v259_v28 = vadd.f32 %v171_v23, %v1025_v8  ;;  %v283_v37 = vadd.f32 %v219_v24, %v1042_v36  ;;  %v515_v9 = vadd.f32 %v514_v45, %v513_v32 }
 0x109   :  { %v328_v31 = vadd.f32 %v327_v5, %v326_v12  ;;  %v341_v33 = vrot.slane %v340_v26, 2  ;;  %v550_v4 = vmul.f32 %v1061_v7, %v337_v49  ;;  %v496_v22 = vadd.f32 %v495_v59, %v494_v42 }
 0x10a   :  { %v359_v34 = vsel %vm316_vm2, %v290_v27, 0.0  ;;  %v291_v35 = vmax.f32 %v259_v28, 0.0  ;;  %v315_v50 = vmax.f32 %v283_v37, 0.0  ;;  %v376_v24 = vrot.slane %v375_v3, 2 }
 0x10b   :  { %v329_v39 = vrot.slane %v328_v31, 1  ;;  %v360_v41 = vrot.slane %v359_v34, 4  ;;  %v342_v43 = vadd.f32 %v341_v33, %v340_v26  ;;  %v516_v28 = vrot.slane %v515_v9, 2 }
 0x10c   :  { %v366_v44 = vsel %vm316_vm2, %v291_v35, 0.0  ;;  %v534_v10 = vsel %vm316_vm2, %v315_v50, 0.0  ;;  %v497_v37 = vrot.slane %v496_v22, 1  ;;  %v1096_v49 = vadd.f32 %v376_v24, %v375_v3 }
 0x10d   :  { %v330_v8 = vadd.f32 %v329_v39, %v328_v31  ;;  %v361_v20 = vadd.f32 %v360_v41, %v359_v34  ;;  %v367_v46 = vrot.slane %v366_v44, 4  ;;  %v211_v47 = vpop.permute.xlu0 %210  ;;  %v343_v18 = vrot.slane %v342_v43, 1 }
 0x10e   :  { %v279_v51 = vadd.f32 %v211_v47, %v1042_v36  ;;  %v535_v15 = vrot.slane %v534_v10, 4  ;;  %v517_v45 = vadd.f32 %v516_v28, %v515_v9  ;;  %v498_v58 = vadd.f32 %v497_v37, %v496_v22 }
 0x10f   :  { %v549_v53 = vmul.f32 %v1061_v7, %v330_v8  ;;  %v362_v54 = vrot.slane %v361_v20, 2  ;;  %v368_v55 = vadd.f32 %v367_v46, %v366_v44  ;;  %v205_v56 = vpop.permute.xlu1 %204  ;;  %v179_v57 = vpop.permute.xlu2 %178  ;;  %v344_v60 = vadd.f32 %v343_v18, %v342_v43 }
 0x110   :  { %v311_v61 = vmax.f32 %v279_v51, 0.0  ;;  %v276_v1 = vadd.f32 %v205_v56, %v1042_v36  ;;  %v536_v38 = vadd.f32 %v535_v15, %v534_v10  ;;  %v263_v39 = vadd.f32 %v179_v57, %v1046_v40 }
 0x111   :  { %v621_v62 = vsel %vm620_vm4, %v549_v53, %v548_v52  ;;  %v363_v63 = vadd.f32 %v362_v54, %v361_v20  ;;  %v369_v0 = vrot.slane %v368_v55, 2  ;;  %v551_v11 = vmul.f32 %v1061_v7, %v344_v60 }
 0x112   :  { %v308_v2 = vmax.f32 %v276_v1, 0.0  ;;  %v506_v16 = vsel %vm316_vm2, %v311_v61, 0.0  ;;  %v623_v17 = vsel %vm622_vm5, %v550_v4, %v621_v62  ;;  %v295_v56 = vmax.f32 %v263_v39, 0.0 }
 0x113   :  { %v364_v12 = vrot.slane %v363_v63, 1  ;;  %v370_v13 = vadd.f32 %v369_v0, %v368_v55  ;;  %v507_v29 = vrot.slane %v506_v16, 4  ;;  %v625_v31 = vsel %vm624_vm6, %v551_v11, %v623_v17 }
 0x114   :  { %v485_v5 = vsel %vm316_vm2, %v308_v2, 0.0  ;;  %v627_v8 = vsel %vm626_vm7, %v1068_v21, %v625_v31  ;;  %v537_v55 = vrot.slane %v536_v38, 2  ;;  %v518_v59 = vrot.slane %v517_v45, 1 }
 0x115   :  { %v371_v19 = vrot.slane %v370_v13, 1  ;;  %v215_v23 = vpop.permute.xlu0 %214  ;;  %v365_v25 = vadd.f32 %v364_v12, %v363_v63  ;;  %v486_v26 = vrot.slane %v485_v5, 4  ;;  %v508_v20 = vadd.f32 %v507_v29, %v506_v16 }
 0x116   :  { %v281_v27 = vadd.f32 %v215_v23, %v1042_v36  ;;  %v629_v53 = vsel %vm628_vm8, %v553_v14, %v627_v8  ;;  %v1106_v4 = vadd.f32 %v1021_v6, %v995_v48  ;;  %v378_v9 = vrot.slane %v1096_v49, 1 }
 0x117   :  { %v209_v30 = vpop.permute.xlu1 %208  ;;  %v372_v32 = vadd.f32 %v371_v19, %v370_v13  ;;  %v487_v33 = vadd.f32 %v486_v26, %v485_v5  ;;  %v185_v35 = vpop.permute.xlu2 %184  ;;  %v554_v44 = vmul.f32 %v1061_v7, %v365_v25  ;;  %v509_v60 = vrot.slane %v508_v20, 2 }
 0x118   :  { %v313_v34 = vmax.f32 %v281_v27, 0.0  ;;  %v278_v41 = vadd.f32 %v209_v30, %v1042_v36  ;;  %v266_v47 = vadd.f32 %v185_v35, %v1046_v40  ;;  %v538_v12 = vadd.f32 %v537_v55, %v536_v38 }
 0x119   :  { %v488_v42 = vrot.slane %v487_v33, 2  ;;  %v555_v50 = vmul.f32 %v1061_v7, %v372_v32  ;;  %v631_v57 = vsel %vm630_vm9, %v554_v44, %v629_v53  ;;  %v394_v13 = vsel %vm316_vm2, %v295_v56, 0.0 }
 0x11a   :  { %v520_v43 = vsel %vm316_vm2, %v313_v34, 0.0  ;;  %v310_v46 = vmax.f32 %v278_v41, 0.0  ;;  %v298_v61 = vmax.f32 %v266_v47, 0.0  ;;  %v573_v17 = vmul.f32 %v1061_v7, %v498_v58 }
 0x11b   :  { %v521_v18 = vrot.slane %v520_v43, 4  ;;  %v489_v51 = vadd.f32 %v488_v42, %v487_v33  ;;  %v633_v1 = vsel %vm632_vm10, %v555_v50, %v631_v57  ;;  %v510_v22 = vadd.f32 %v509_v60, %v508_v20 }
 0x11c   :  { %v499_v52 = vsel %vm316_vm2, %v310_v46, 0.0  ;;  %832 = vmatmul.msk.f32.vlgmr.msra.gmra.mxu1 %vm316_vm2, %v633_v1  ;;  %v415_v15 = vsel %vm316_vm2, %v298_v61, 0.0  ;;  %v395_v24 = vrot.slane %v394_v13, 4  ;;  %v539_v28 = vrot.slane %v538_v12, 1 }
 0x11d   :  { %v217_v54 = vpop.permute.xlu0 %216  ;;  %v500_v21 = vrot.slane %v499_v52, 4  ;;  %v522_v63 = vadd.f32 %v521_v18, %v520_v43  ;;  %v490_v10 = vrot.slane %v489_v51, 1  ;;  %v511_v32 = vrot.slane %v510_v22, 1 }
 0x11e   :  { %v282_v3 = vadd.f32 %v217_v54, %v1042_v36  ;;  %v519_v36 = vadd.f32 %v518_v59, %v517_v45  ;;  %v416_v33 = vrot.slane %v415_v15, 4  ;;  %v396_v44 = vadd.f32 %v395_v24, %v394_v13 }
 0x11f   :  { %v177_v62 = vpop.permute.xlu1 %176  ;;  %v501_v0 = vadd.f32 %v500_v21, %v499_v52  ;;  %v191_v16 = vpop.permute.xlu2 %190  ;;  %v523_v48 = vrot.slane %v522_v63, 2  ;;  %v491_v23 = vadd.f32 %v490_v10, %v489_v51  ;;  %v512_v50 = vadd.f32 %v511_v32, %v510_v22 }
 0x120   :  { %v262_v11 = vadd.f32 %v177_v62, %v1046_v40  ;;  %v314_v14 = vmax.f32 %v282_v3, 0.0  ;;  %v269_v26 = vadd.f32 %v191_v16, %v1106_v4  ;;  %v417_v51 = vadd.f32 %v416_v33, %v415_v15 }
 0x121   :  { %v502_v2 = vrot.slane %v501_v0, 2  ;;  %v524_v38 = vadd.f32 %v523_v48, %v522_v63  ;;  %v572_v43 = vmul.f32 %v1061_v7, %v491_v23  ;;  %v1123_v54 = vadd.f32 %v378_v9, %v1096_v49 }
 0x122   :  { %v294_v19 = vmax.f32 %v262_v11, 0.0  ;;  %v527_v5 = vsel %vm316_vm2, %v314_v14, 0.0  ;;  %v301_v45 = vmax.f32 %v269_v26, 0.0  ;;  %v576_v55 = vmul.f32 %v1061_v7, %v519_v36 }
 0x123   :  { %v503_v6 = vadd.f32 %v502_v2, %v501_v0  ;;  %v528_v25 = vrot.slane %v527_v5, 4  ;;  %v540_v56 = vadd.f32 %v539_v28, %v538_v12  ;;  %v525_v21 = vrot.slane %v524_v38, 1 }
 0x124   :  { %v387_v30 = vsel %vm316_vm2, %v294_v19, 0.0  ;;  %v648_v57 = vsel %vm620_vm4, %v573_v17, %v572_v43  ;;  %v436_v63 = vsel %vm316_vm2, %v301_v45, 0.0  ;;  %v575_v49 = vmul.f32 %v1061_v7, %v512_v50 }
 0x125   :  { %v175_v27 = vpop.permute.xlu0 %174  ;;  %v504_v29 = vrot.slane %v503_v6, 1  ;;  %v529_v34 = vadd.f32 %v528_v25, %v527_v5  ;;  %v388_v35 = vrot.slane %v387_v30, 4  ;;  %v397_v3 = vrot.slane %v396_v44, 2 }
 0x126   :  { %v261_v31 = vadd.f32 %v175_v27, %v1046_v40  ;;  %v418_v9 = vrot.slane %v417_v51, 2  ;;  %v526_v17 = vadd.f32 %v525_v21, %v524_v38  ;;  %v437_v36 = vrot.slane %v436_v63, 4 }
 0x127   :  { %v187_v37 = vpop.permute.xlu1 %186  ;;  %v505_v39 = vadd.f32 %v504_v29, %v503_v6  ;;  %v530_v8 = vrot.slane %v529_v34, 2  ;;  %v389_v46 = vadd.f32 %v388_v35, %v387_v30  ;;  %v199_v11 = vpop.permute.xlu2 %198  ;;  %v398_v23 = vadd.f32 %v397_v3, %v396_v44 }
 0x128   :  { %v293_v41 = vmax.f32 %v261_v31, 0.0  ;;  %v267_v42 = vadd.f32 %v187_v37, %v1046_v40  ;;  %v273_v6 = vadd.f32 %v199_v11, %v1106_v4  ;;  %v579_v26 = vmul.f32 %v1061_v7, %v540_v56 }
 0x129   :  { %v574_v20 = vmul.f32 %v1061_v7, %v505_v39  ;;  %v531_v52 = vadd.f32 %v530_v8, %v529_v34  ;;  %v390_v62 = vrot.slane %v389_v46, 2  ;;  %v577_v31 = vmul.f32 %v1061_v7, %v526_v17 }
 0x12a   :  { %v380_v47 = vsel %vm316_vm2, %v293_v41, 0.0  ;;  %v299_v18 = vmax.f32 %v267_v42, 0.0  ;;  %v438_v32 = vadd.f32 %v437_v36, %v436_v63  ;;  %v419_v37 = vadd.f32 %v418_v9, %v417_v51 }
 0x12b   :  { %v381_v53 = vrot.slane %v380_v47, 4  ;;  %v532_v58 = vrot.slane %v531_v52, 1  ;;  %v649_v1 = vsel %vm622_vm5, %v574_v20, %v648_v57  ;;  %v391_v48 = vadd.f32 %v390_v62, %v389_v46 }
 0x12c   :  { %v422_v60 = vsel %vm316_vm2, %v299_v18, 0.0  ;;  %v650_v19 = vsel %vm624_vm6, %v575_v49, %v649_v1  ;;  %v305_v39 = vmax.f32 %v273_v6, 0.0  ;;  %v399_v50 = vrot.slane %v398_v23, 1 }
 0x12d   :  { %v382_v59 = vadd.f32 %v381_v53, %v380_v47  ;;  %v181_v61 = vpop.permute.xlu0 %180  ;;  %v533_v13 = vadd.f32 %v532_v58, %v531_v52  ;;  %v423_v2 = vrot.slane %v422_v60, 4  ;;  %v651_v30 = vsel %vm626_vm7, %v576_v55, %v650_v19 }
 0x12e   :  { %v264_v0 = vadd.f32 %v181_v61, %v1046_v40  ;;  %v392_v38 = vrot.slane %v391_v48, 1  ;;  %v652_v8 = vsel %vm628_vm8, %v577_v31, %v651_v30  ;;  %v439_v52 = vrot.slane %v438_v32, 2 }
 0x12f   :  { %v383_v10 = vrot.slane %v382_v59, 2  ;;  %v189_v12 = vpop.permute.xlu1 %188  ;;  %v424_v27 = vadd.f32 %v423_v2, %v422_v60  ;;  %v578_v29 = vmul.f32 %v1061_v7, %v533_v13  ;;  %v420_v55 = vrot.slane %v419_v37, 1 }
 0x130   :  { %v296_v14 = vmax.f32 %v264_v0, 0.0  ;;  %v268_v16 = vadd.f32 %v189_v12, %v1106_v4  ;;  %v393_v56 = vadd.f32 %v392_v38, %v391_v48  ;;  %v464_v58 = vsel %vm316_vm2, %v305_v39, 0.0 }
 0x131   :  { %v384_v22 = vadd.f32 %v383_v10, %v382_v59  ;;  %v425_v20 = vrot.slane %v424_v27, 2  ;;  %v653_v46 = vsel %vm630_vm9, %v578_v29, %v652_v8  ;;  %v556_v61 = vmul.f32 %v1061_v7, %v1123_v54 }
 0x132   :  { %v401_v15 = vsel %vm316_vm2, %v296_v14, 0.0  ;;  %v300_v5 = vmax.f32 %v268_v16, 0.0  ;;  %v654_v51 = vsel %vm632_vm10, %v579_v26, %v653_v46  ;;  %v400_v1 = vadd.f32 %v399_v50, %v398_v23 }
 0x133   :  { %v385_v24 = vrot.slane %v384_v22, 1  ;;  %v402_v25 = vrot.slane %v401_v15, 4  ;;  %835 = vmatmul.msk.f32.vlgmr.msra.gmra.mxu2 %vm316_vm2, %v654_v51  ;;  %v426_v62 = vadd.f32 %v425_v20, %v424_v27  ;;  %v440_v49 = vadd.f32 %v439_v52, %v438_v32 }
 0x134   :  { %v429_v28 = vsel %vm316_vm2, %v300_v5, 0.0  ;;  %v421_v11 = vadd.f32 %v420_v55, %v419_v37  ;;  %v558_v12 = vmul.f32 %v1061_v7, %v393_v56  ;;  %v465_v13 = vrot.slane %v464_v58, 4 }
 0x135   :  { %v403_v33 = vadd.f32 %v402_v25, %v401_v15  ;;  %v430_v34 = vrot.slane %v429_v28, 4  ;;  %v183_v35 = vpop.permute.xlu0 %182  ;;  %v386_v42 = vadd.f32 %v385_v24, %v384_v22  ;;  %v427_v22 = vrot.slane %v426_v62, 1 }
 0x136   :  { %v265_v41 = vadd.f32 %v183_v35, %v1046_v40  ;;  %v559_v15 = vmul.f32 %v1061_v7, %v400_v1  ;;  %v441_v5 = vrot.slane %v440_v49, 1  ;;  %v466_v25 = vadd.f32 %v465_v13, %v464_v58 }
 0x137   :  { %v404_v43 = vrot.slane %v403_v33, 2  ;;  %v431_v44 = vadd.f32 %v430_v34, %v429_v28  ;;  %v193_v45 = vpop.permute.xlu1 %192  ;;  %v557_v57 = vmul.f32 %v1061_v7, %v386_v42  ;;  %v562_v37 = vmul.f32 %v1061_v7, %v421_v11 }
 0x138   :  { %v297_v47 = vmax.f32 %v265_v41, 0.0  ;;  %v270_v18 = vadd.f32 %v193_v45, %v1106_v4  ;;  %v467_v8 = vrot.slane %v466_v25, 2 }
 0x139   :  { %v405_v53 = vadd.f32 %v404_v43, %v403_v33  ;;  %v432_v59 = vrot.slane %v431_v44, 2  ;;  %v634_v14 = vsel %vm620_vm4, %v557_v57, %v556_v61  ;;  %v428_v33 = vadd.f32 %v427_v22, %v426_v62 }
 0x13a   :  { %v408_v40 = vsel %vm316_vm2, %v297_v47, 0.0  ;;  %v302_v21 = vmax.f32 %v270_v18, 0.0  ;;  %v635_v28 = vsel %vm622_vm5, %v558_v12, %v634_v14 }
 0x13b   :  { %v409_v60 = vrot.slane %v408_v40, 4  ;;  %v406_v63 = vrot.slane %v405_v53, 1  ;;  %v433_v16 = vadd.f32 %v432_v59, %v431_v44  ;;  %v442_v44 = vadd.f32 %v441_v5, %v440_v49 }
 0x13c   :  { %v443_v0 = vsel %vm316_vm2, %v302_v21, 0.0  ;;  %v636_v20 = vsel %vm624_vm6, %v559_v15, %v635_v28  ;;  %v563_v57 = vmul.f32 %v1061_v7, %v428_v33  ;;  %v468_v59 = vadd.f32 %v467_v8, %v466_v25  ;;  %v760_v8 = vld [vmem:[%s1241_s7 + $0x18] sm:$0xff] }
 0x13d   :  { %v410_v3 = vadd.f32 %v409_v60, %v408_v40  ;;  %v444_v9 = vrot.slane %v443_v0, 4  ;;  %v195_v10 = vpop.permute.xlu0 %194  ;;  %v407_v19 = vadd.f32 %v406_v63, %v405_v53  ;;  %v434_v29 = vrot.slane %v433_v16, 1  ;;  %780 = vmatpush.msrb.mxu3 %v760_v8 }
 0x13e   :  { %v271_v2 = vadd.f32 %v195_v10, %v1106_v4  ;;  %v469_v14 = vrot.slane %v468_v59, 1 }
 0x13f   :  { %v411_v17 = vrot.slane %v410_v3, 2  ;;  %v445_v54 = vadd.f32 %v444_v9, %v443_v0  ;;  %v197_v36 = vpop.permute.xlu1 %196  ;;  %v560_v34 = vmul.f32 %v1061_v7, %v407_v19  ;;  %v435_v46 = vadd.f32 %v434_v29, %v433_v16 }
 0x140   :  { %v303_v48 = vmax.f32 %v271_v2, 0.0  ;;  %v272_v6 = vadd.f32 %v197_v36, %v1106_v4  ;;  %v565_v2 = vmul.f32 %v1061_v7, %v442_v44  ;;  %v470_v5 = vadd.f32 %v469_v14, %v468_v59 }
 0x141   :  { %v412_v23 = vadd.f32 %v411_v17, %v410_v3  ;;  %v446_v24 = vrot.slane %v445_v54, 2  ;;  %v637_v56 = vsel %vm626_vm7, %v560_v34, %v636_v20 }
 0x142   :  { %v450_v26 = vsel %vm316_vm2, %v303_v48, 0.0  ;;  %v304_v27 = vmax.f32 %v272_v6, 0.0  ;;  %v569_v29 = vmul.f32 %v1061_v7, %v470_v5  ;;  %v849_v5 = vld [vmem:[%s1242_s8] ss:$0 sm:$0xff] }
 0x143   :  { %v413_v30 = vrot.slane %v412_v23, 1  ;;  %v447_v31 = vadd.f32 %v446_v24, %v445_v54  ;;  %v451_v32 = vrot.slane %v450_v26, 4 }
 0x144   :  { %v457_v35 = vsel %vm316_vm2, %v304_v27, 0.0 }
 0x145   :  { %v414_v38 = vadd.f32 %v413_v30, %v412_v23  ;;  %v448_v39 = vrot.slane %v447_v31, 1  ;;  %v452_v41 = vadd.f32 %v451_v32, %v450_v26  ;;  %v458_v42 = vrot.slane %v457_v35, 4  ;;  %v201_v43 = vpop.permute.xlu0 %200 }
 0x146   :  { %v274_v45 = vadd.f32 %v201_v43, %v1106_v4 }
 0x147   :  { %v561_v47 = vmul.f32 %v1061_v7, %v414_v38  ;;  %v453_v18 = vrot.slane %v452_v41, 2  ;;  %v459_v50 = vadd.f32 %v458_v42, %v457_v35  ;;  %v203_v52 = vpop.permute.xlu1 %202  ;;  %v449_v53 = vadd.f32 %v448_v39, %v447_v31  ;;  %v847_v38 = vld [vmem:[%s1238_s4] ss:$0 sm:$0xff]  ;;  %v722_v39 = vld [vmem:[%s1239_s5 + $0x8] sm:$0xff] }
 0x148   :  { %v306_v51 = vmax.f32 %v274_v45, 0.0  ;;  %v275_v55 = vadd.f32 %v203_v52, %v1106_v4  ;;  %v564_v4 = vmul.f32 %v1061_v7, %v435_v46  ;;  %750 = vmatpush.msrb.mxu2 %v722_v39  ;;  %v759_v45 = vld [vmem:[%s1241_s7 + $0x10] sm:$0xff] }
 0x149   :  { %v454_v40 = vadd.f32 %v453_v18, %v452_v41  ;;  %v460_v21 = vrot.slane %v459_v50, 2  ;;  %v638_v58 = vsel %vm628_vm8, %v561_v47, %v637_v56  ;;  %v566_v3 = vmul.f32 %v1061_v7, %v449_v53  ;;  %v721_v41 = vld [vmem:[%s1239_s5] sm:$0xff]  ;;  %781 = vmatpush.msrb.mxu3 %v759_v45 }
 0x14a   :  { %v471_v60 = vsel %vm316_vm2, %v306_v51, 0.0  ;;  %v307_v61 = vmax.f32 %v275_v55, 0.0  ;;  %v639_v62 = vsel %vm630_vm9, %v562_v37, %v638_v58  ;;  %v641_v22 = vsel %vm620_vm4, %v565_v2, %v564_v4  ;;  %751 = vmatpush.msrb.mxu2 %v721_v41 }
 0x14b   :  { %v455_v63 = vrot.slane %v454_v40, 1  ;;  %v461_v0 = vadd.f32 %v460_v21, %v459_v50  ;;  %v472_v1 = vrot.slane %v471_v60, 4  ;;  %v640_v49 = vsel %vm632_vm10, %v563_v57, %v639_v62 }
 0x14c   :  { %v478_v9 = vsel %vm316_vm2, %v307_v61, 0.0  ;;  %833 = vmatmul.msk.f32.gmra.mxu1 %vm316_vm2, %v640_v49  ;;  %v642_v15 = vsel %vm622_vm5, %v566_v3, %v641_v22  ;;  %v757_v22 = vld [vmem:[%s1241_s7] sm:$0xff] }
 0x14d   :  { %v456_v10 = vadd.f32 %v455_v63, %v454_v40  ;;  %v462_v11 = vrot.slane %v461_v0, 1  ;;  %v473_v12 = vadd.f32 %v472_v1, %v471_v60  ;;  %v479_v13 = vrot.slane %v478_v9, 4 }
 0x14f   :  { %v567_v16 = vmul.f32 %v1061_v7, %v456_v10  ;;  %v463_v17 = vadd.f32 %v462_v11, %v461_v0  ;;  %v474_v54 = vrot.slane %v473_v12, 2  ;;  %v480_v36 = vadd.f32 %v479_v13, %v478_v9 }
 0x151   :  { %v568_v19 = vmul.f32 %v1061_v7, %v463_v17  ;;  %v475_v48 = vadd.f32 %v474_v54, %v473_v12  ;;  %v481_v6 = vrot.slane %v480_v36, 2  ;;  %v643_v23 = vsel %vm624_vm6, %v567_v16, %v642_v15 }
 0x153   :  { %v476_v24 = vrot.slane %v475_v48, 1  ;;  %v482_v25 = vadd.f32 %v481_v6, %v480_v36  ;;  %v644_v28 = vsel %vm626_vm7, %v568_v19, %v643_v23  ;;  %v758_v36 = vld [vmem:[%s1241_s7 + $0x8] sm:$0xff]  ;;  %v848_v19 = vld [vmem:[%s1240_s6] ss:$0 sm:$0xff]  ;;  %s880_s6 = smov [#allocation2]  }
 0x154   :  { %v645_v32 = vsel %vm628_vm8, %v569_v29, %v644_v28  ;;  %782 = vmatpush.msrb.mxu3 %v758_v36  ;;  %s816_s7 = sshll.u32 %s880_s6, 4  ;;  %s817_s7 = int_to_ptr.vmem [resolvable:$true] %s816_s7 }
 0x155   :  { %v477_v26 = vadd.f32 %v476_v24, %v475_v48  ;;  %v483_v27 = vrot.slane %v482_v25, 1 }
 0x156   :  { %783 = vmatpush.msrb.mxu3 %v757_v22 }
 0x157   :  { %v484_v30 = vadd.f32 %v483_v27, %v482_v25  ;;  %v570_v31 = vmul.f32 %v1061_v7, %v477_v26 }
 0x159   :  { %v571_v33 = vmul.f32 %v1061_v7, %v484_v30  ;;  %v646_v34 = vsel %vm630_vm9, %v570_v31, %v645_v32 }
 0x15b   :  { %v647_v35 = vsel %vm632_vm10, %v571_v33, %v646_v34 }
 0x15c   :  { %834 = vmatmul.msk.f32.gmra.mxu1 %vm316_vm2, %v647_v35 }
 0x199   :  { %v680_v37 = vpop.f32.mrf.mxu1 }
 0x19a   :  { %v681_v44 = vadd.f32 %v847_v38, %v680_v37 }
 0x19c   :  { %v693_v47 = vsel %vm692_vm11, %v681_v44, -inf }
 0x19d   :  { %v694_v52 = vrot.slane %v693_v47, 4 }
 0x19f   :  { %v695_v55 = vmax.f32 %v693_v47, %v694_v52 }
 0x1a1   :  { %v696_v57 = vrot.slane %v695_v55, 2 }
 0x1a3   :  { %v697_v63 = vmax.f32 %v695_v55, %v696_v57 }
 0x1a5   :  { %v698_v3 = vrot.slane %v697_v63, 1 }
 0x1a7   :  { %v699_v13 = vmax.f32 %v697_v63, %v698_v3 }
 0x1b6   :  { %v689_v42 = vpop.f32.mrf.mxu2 }
 0x1b7   :  { %v690_v20 = vadd.f32 %v847_v38, %v689_v42 }
 0x1b9   :  { %v714_v50 = vsel %vm692_vm11, %v690_v20, -inf }
 0x1ba   :  { %v715_v53 = vrot.slane %v714_v50, 4 }
 0x1bc   :  { %v716_v56 = vmax.f32 %v714_v50, %v715_v53 }
 0x1be   :  { %v717_v59 = vrot.slane %v716_v56, 2 }
 0x1c0   :  { %v718_v1 = vmax.f32 %v716_v56, %v717_v59 }
 0x1c2   :  { %v719_v10 = vrot.slane %v718_v1, 1 }
 0x1c4   :  { %v720_v14 = vmax.f32 %v718_v1, %v719_v10 }
 0x1c9   :  { %v683_v7 = vpop.f32.mrf.mxu1 }
 0x1ca   :  { %v684_v43 = vadd.f32 %v847_v38, %v683_v7 }
 0x1cc   :  { %v700_v46 = vsel %vm692_vm11, %v684_v43, -inf }
 0x1cd   :  { %v701_v18 = vrot.slane %v700_v46, 4 }
 0x1cf   :  { %v702_v51 = vmax.f32 %v700_v46, %v701_v18 }
 0x1d1   :  { %v703_v40 = vrot.slane %v702_v51, 2 }
 0x1d3   :  { %v704_v60 = vmax.f32 %v702_v51, %v703_v40 }
 0x1d5   :  { %v705_v49 = vrot.slane %v704_v60, 1 }
 0x1d7   :  { %v706_v11 = vmax.f32 %v704_v60, %v705_v49 }
 0x1d9   :  { %v686_v21 = vpop.f32.mrf.mxu1  ;;  %v731_v16 = vsel %vm620_vm4, %v706_v11, %v699_v13 }
 0x1da   :  { %v687_v58 = vadd.f32 %v847_v38, %v686_v21 }
 0x1dc   :  { %v707_v61 = vsel %vm692_vm11, %v687_v58, -inf }
 0x1dd   :  { %v708_v62 = vrot.slane %v707_v61, 4 }
 0x1df   :  { %v709_v0 = vmax.f32 %v707_v61, %v708_v62 }
 0x1e1   :  { %v710_v4 = vrot.slane %v709_v0, 2 }
 0x1e3   :  { %v711_v9 = vmax.f32 %v709_v0, %v710_v4 }
 0x1e5   :  { %v712_v12 = vrot.slane %v711_v9, 1 }
 0x1e7   :  { %v713_v2 = vmax.f32 %v711_v9, %v712_v12 }
 0x1e9   :  { %v732_v17 = vsel %vm622_vm5, %v713_v2, %v731_v16 }
 0x1ea   :  { %v733_v54 = vsel %vm624_vm6, %v720_v14, %v732_v17 }
 0x1eb   :  { %836 = vmatmul.msk.f32.vlgmr.msrb.gmra.mxu2 %vm692_vm11, %v733_v54 }
 0x26e   :  { %v753_v48 = vpop.f32.mrf.mxu2 }
 0x26f   :  { %v754_v6 = vadd.f32 %v848_v19, %v753_v48 }
 0x271   :  { %v756_v15 = vmax.f32 %v754_v6, 0.0 }
 0x273   :  { %837 = vmatmul.msk.f32.vlgmr.msrb.gmra.mxu3 %vm316_vm2, %v756_v15 }
 0x2f6   :  { %v785_v23 = vpop.f32.mrf.mxu3 }
 0x2f7   :  { %v786_v24 = vadd.f32 %v849_v5, %v785_v23 }
 0x2f9   :  { %v789_v25 = vrot.slane %v786_v24, 2  ;;  %v792_v26 = vsel %vm791_vm12, %v786_v24, -inf }
 0x2fa   :  { %v793_v27 = vrot.slane %v792_v26, 4 }
 0x2fb   :  { %v799_v28 = vsel %vm791_vm12, %v789_v25, -inf }
 0x2fc   :  { %v794_v29 = vmax.f32 %v792_v26, %v793_v27  ;;  %v800_v30 = vrot.slane %v799_v28, 4 }
 0x2fe   :  { %v795_v31 = vrot.slane %v794_v29, 2  ;;  %v801_v32 = vmax.f32 %v799_v28, %v800_v30 }
 0x300   :  { %v796_v33 = vmax.f32 %v794_v29, %v795_v31  ;;  %v802_v34 = vrot.slane %v801_v32, 2 }
 0x302   :  { %v797_v35 = vrot.slane %v796_v33, 1  ;;  %v803_v37 = vmax.f32 %v801_v32, %v802_v34 }
 0x304   :  { %v804_v38 = vrot.slane %v803_v37, 1  ;;  %v798_v39 = vmax.f32 %v796_v33, %v797_v35 }
 0x306   :  { %v805_v41 = vmax.f32 %v803_v37, %v804_v38 }
 0x308   :  { %v808_v7 = vsel %vm620_vm4, %v805_v41, %v798_v39 }
 0x309   :  { %810 = vst.msk [vmem:[#allocation2] sm:$0x3] %vm791_vm12, %v808_v7 }
 0x30a   :  { %821 = dma.vmem_to_hbm [thread:$0]  %s817_s7, 32, %s819_s2, [#allocation3]  }
 0x30b   :  { %876 = dma.done.wait [#allocation3], 32  }
 0x30c   :  { %877 = vsyncadd [#allocation3], 4294967264 }
 0x30d   :  { %826 = vsyncpa [#allocation3], 1 }

</bundles_post_ra>
